<compile_context>
chip_gen: v5e
topology: v5e:2x2
jax: 0.10.0
libtpu: 0.0.40
codegen_flags: <defaults>
</compile_context>

<pallas_src>
import jax
import jax.numpy as jnp
import numpy as np
from jax import lax
from jax.experimental import pallas as pl
from jax.experimental.pallas import tpu as pltpu


def _round_up(x, m):
    return ((x + m - 1) // m) * m


# -----------------------------------------------------------------------------
# Parallel input projection: pre_gates = X @ W_ih^T + (b_ih + b_hh)
# X is (S*Bp, E); output (S*Bp, 4*Hp). Pure parallel matmul -> big MXU tiles.
# -----------------------------------------------------------------------------
def _proj_kernel(x_ref, w_ref, b_ref, o_ref):
    o_ref[...] = (jnp.dot(x_ref[...], w_ref[...], preferred_element_type=jnp.float32)
                  + b_ref[...])


def input_projection_pallas(x2d, w_ih_t_pad, bias_pad):
    M, E = x2d.shape
    G = w_ih_t_pad.shape[1]            # 4 * Hp
    tm = M
    for cand in (512, 256, 128, 64, 32, 16, 8):
        if M % cand == 0:
            tm = cand
            break
    return pl.pallas_call(
        _proj_kernel,
        out_shape=jax.ShapeDtypeStruct((M, G), jnp.float32),
        grid=(M // tm,),
        in_specs=[
            pl.BlockSpec((tm, E), lambda i: (i, 0)),
            pl.BlockSpec((E, G), lambda i: (0, 0)),
            pl.BlockSpec((1, G), lambda i: (0, 0)),
        ],
        out_specs=pl.BlockSpec((tm, G), lambda i: (i, 0)),
        compiler_params=pltpu.CompilerParams(dimension_semantics=("parallel",)),
    )(x2d, w_ih_t_pad, bias_pad)


# -----------------------------------------------------------------------------
# Recurrent LSTM kernel. grid = (batch_blocks, time_blocks); time is sequential.
# Each grid step processes Ts timesteps with an unrolled inner loop; only the
# h @ W_hh^T matmul remains on the serial path. Gate slices are Hp-aligned
# (multiples of 128 lanes), outputs are lane-dense (..., Hp) blocks.
# -----------------------------------------------------------------------------
def _make_lstm_kernel(Ts, Hp):
    def kernel(pre_ref, whh_ref, h0_ref, c0_ref,
               out_ref, hn_ref, cn_ref, h_scr, c_scr):
        t = pl.program_id(1)

        @pl.when(t == 0)
        def _():
            h_scr[...] = h0_ref[...]
            c_scr[...] = c0_ref[...]

        whh = whh_ref[...]              # (Hp, 4*Hp) resident in VMEM

        def step(s, carry):
            h, c = carry
            g = pre_ref[s] + jnp.dot(h, whh, preferred_element_type=jnp.float32)  # (Bb, 4Hp)
            i_g = jax.nn.sigmoid(g[:, 0 * Hp:1 * Hp])
            f_g = jax.nn.sigmoid(g[:, 1 * Hp:2 * Hp])
            g_g = jnp.tanh(g[:, 2 * Hp:3 * Hp])
            o_g = jax.nn.sigmoid(g[:, 3 * Hp:4 * Hp])
            c_new = f_g * c + i_g * g_g
            h_new = o_g * jnp.tanh(c_new)
            out_ref[s] = h_new.astype(out_ref.dtype)
            return (h_new, c_new)

        h_fin, c_fin = lax.fori_loop(0, Ts, step, (h_scr[...], c_scr[...]), unroll=True)
        h_scr[...] = h_fin
        c_scr[...] = c_fin

        @pl.when(t == pl.num_programs(1) - 1)
        def _():
            hn_ref[...] = h_fin.astype(hn_ref.dtype)
            cn_ref[...] = c_fin.astype(cn_ref.dtype)

    return kernel


def lstm_pallas(pre_gates, whh_t_pad, h0p, c0p, Ts, Bb):
    """pre_gates: (S, Bp, 4*Hp) f32; whh_t_pad: (Hp, 4*Hp); h0p/c0p: (Bp, Hp).
    Returns (out (S, Bp, Hp), h_n (Bp, Hp), c_n (Bp, Hp))."""
    S, Bp, G = pre_gates.shape
    Hp = G // 4
    NT = S // Ts
    NB = Bp // Bb

    kernel = _make_lstm_kernel(Ts, Hp)
    out, hn, cn = pl.pallas_call(
        kernel,
        out_shape=(
            jax.ShapeDtypeStruct((S, Bp, Hp), jnp.float32),
            jax.ShapeDtypeStruct((Bp, Hp), jnp.float32),
            jax.ShapeDtypeStruct((Bp, Hp), jnp.float32),
        ),
        grid=(NB, NT),
        in_specs=[
            pl.BlockSpec((Ts, Bb, G), lambda b, t: (t, b, 0)),
            pl.BlockSpec((Hp, G), lambda b, t: (0, 0)),
            pl.BlockSpec((Bb, Hp), lambda b, t: (b, 0)),
            pl.BlockSpec((Bb, Hp), lambda b, t: (b, 0)),
        ],
        out_specs=(
            pl.BlockSpec((Ts, Bb, Hp), lambda b, t: (t, b, 0)),
            pl.BlockSpec((Bb, Hp), lambda b, t: (b, 0)),
            pl.BlockSpec((Bb, Hp), lambda b, t: (b, 0)),
        ),
        scratch_shapes=[
            pltpu.VMEM((Bb, Hp), jnp.float32),
            pltpu.VMEM((Bb, Hp), jnp.float32),
        ],
        compiler_params=pltpu.CompilerParams(
            dimension_semantics=("parallel", "arbitrary")),
    )(pre_gates, whh_t_pad, h0p, c0p)
    return out, hn, cn


# -----------------------------------------------------------------------------
# Encoder wrapper (embedding lookup + LSTM). dropout=0 -> identity.
# -----------------------------------------------------------------------------
class EncoderPallas:
    def __init__(self, input_dim, emb_dim, hidden_dim, n_layers=1, dropout=0.0, seed=0):
        assert n_layers == 1, "single-layer LSTM kernel"
        self.input_dim = input_dim
        self.emb_dim = emb_dim
        self.hidden_dim = hidden_dim
        self.n_layers = n_layers

        H = hidden_dim
        self.Hp = _round_up(H, 128)     # lane-dense hidden dim used inside the kernels

        key = jax.random.PRNGKey(seed)
        k_emb, k_wih, k_whh, k_bih, k_bhh = jax.random.split(key, 5)
        bound = 1.0 / np.sqrt(H)
        # nn.Embedding default: N(0, 1); nn.LSTM default: U(-1/sqrt(H), 1/sqrt(H))
        self.emb_table = jax.random.normal(k_emb, (input_dim, emb_dim), jnp.float32)
        self.w_ih = jax.random.uniform(k_wih, (4 * H, emb_dim), jnp.float32, -bound, bound)
        self.w_hh = jax.random.uniform(k_whh, (4 * H, H), jnp.float32, -bound, bound)
        self.b_ih = jax.random.uniform(k_bih, (4 * H,), jnp.float32, -bound, bound)
        self.b_hh = jax.random.uniform(k_bhh, (4 * H,), jnp.float32, -bound, bound)

        # --- Kernel-friendly parameters, computed once: transposed, gate-padded, bias-summed.
        # Gate g (width H) occupies columns [g*Hp, g*Hp + H) of the padded 4*Hp gate axis;
        # the padding columns/rows are zero, so padded h/c lanes stay exactly 0.
        Hp = self.Hp

        def pad_gate_cols(w_t):  # (in_dim, 4H) -> (in_dim, 4Hp)
            parts = []
            for g in range(4):
                blk = w_t[:, g * H:(g + 1) * H]
                parts.append(jnp.pad(blk, ((0, 0), (0, Hp - H))))
            return jnp.concatenate(parts, axis=1)

        self.w_ih_t_pad = pad_gate_cols(jnp.transpose(self.w_ih))                  # (E, 4Hp)
        self.w_hh_t_pad = jnp.pad(pad_gate_cols(jnp.transpose(self.w_hh)),
                                  ((0, Hp - H), (0, 0)))                           # (Hp, 4Hp)
        bias = self.b_ih + self.b_hh
        self.bias_pad = jnp.concatenate(
            [jnp.pad(bias[g * H:(g + 1) * H], (0, Hp - H)) for g in range(4)])[None, :]  # (1, 4Hp)

    def __call__(self, inputs, hidden):
        """inputs: int32 (B, S) token ids; hidden: (h0, c0), each (n_layers, B, H).
        Returns (output (B, S, H), (h_n, c_n)) matching PyTorch nn.LSTM(batch_first=True)."""
        h0, c0 = hidden
        B, S = inputs.shape
        H, Hp = self.hidden_dim, self.Hp
        Bp = _round_up(B, 8)            # pad batch to full sublanes

        # Embedding gather directly in time-major order -> (S, B, E); pad batch with zeros.
        emb = jnp.take(self.emb_table, jnp.transpose(inputs), axis=0)
        if Bp != B:
            emb = jnp.pad(emb, ((0, 0), (0, Bp - B), (0, 0)))

        # Hoisted input projection: one big parallel matmul over all S*Bp rows.
        pre = input_projection_pallas(emb.reshape(S * Bp, self.emb_dim),
                                      self.w_ih_t_pad, self.bias_pad)
        pre = pre.reshape(S, Bp, 4 * Hp)

        # Padded initial state (zeros in the padded lanes keep them exactly zero).
        h0p = jnp.zeros((Bp, Hp), jnp.float32).at[:B, :H].set(h0[0])
        c0p = jnp.zeros((Bp, Hp), jnp.float32).at[:B, :H].set(c0[0])

        # Timestep blocking: biggest divisor of S up to 32.
        Ts = 1
        for cand in (32, 16, 8, 4, 2, 1):
            if S % cand == 0:
                Ts = cand
                break
        # Batch blocking: split into 2 blocks (>=8 rows each) so v7x's 2 TCs can share work.
        Bb = Bp // 2 if (Bp % 16 == 0) else Bp

        out, hn, cn = lstm_pallas(pre, self.w_hh_t_pad, h0p, c0p, Ts, Bb)

        output = jnp.transpose(out[:, :B, :H], (1, 0, 2))       # back to batch_first (B, S, H)
        return output, (hn[:B, :H][None], cn[:B, :H][None])


# -----------------------------------------------------------------------------
# Pure-JAX reference (lax.scan LSTM, unpadded) for a correctness check.
# -----------------------------------------------------------------------------
def _reference(enc, inputs, hidden):
    h0, c0 = hidden
    emb = jnp.take(enc.emb_table, inputs, axis=0)              # (B, S, E)
    H = enc.hidden_dim
    wih_t = jnp.transpose(enc.w_ih)
    whh_t = jnp.transpose(enc.w_hh)
    b = enc.b_ih + enc.b_hh

    def step(carry, x_t):
        h, c = carry
        gates = x_t @ wih_t + h @ whh_t + b
        i = jax.nn.sigmoid(gates[:, 0 * H:1 * H])
        f = jax.nn.sigmoid(gates[:, 1 * H:2 * H])
        g = jnp.tanh(gates[:, 2 * H:3 * H])
        o = jax.nn.sigmoid(gates[:, 3 * H:4 * H])
        c_new = f * c + i * g
        h_new = o * jnp.tanh(c_new)
        return (h_new, c_new), h_new

    (hn, cn), outs = lax.scan(step, (h0[0], c0[0]), jnp.transpose(emb, (1, 0, 2)))
    return jnp.transpose(outs, (1, 0, 2)), (hn[None], cn[None])


if __name__ == "__main__":
    B, S = 2, 8
    input_dim, emb_dim, hidden_dim = 16, 32, 32

    enc = EncoderPallas(input_dim, emb_dim, hidden_dim, n_layers=1, dropout=0.0, seed=0)

    key = jax.random.PRNGKey(0)
    k_tok, k_h, k_c = jax.random.split(key, 3)
    inputs = jax.random.randint(k_tok, (B, S), 0, input_dim, dtype=jnp.int32)
    h0 = jax.random.normal(k_h, (1, B, hidden_dim), jnp.float32)
    c0 = jax.random.normal(k_c, (1, B, hidden_dim), jnp.float32)

    output, (hn, cn) = enc(inputs, (h0, c0))
    jax.block_until_ready((output, hn, cn))

    ref_out, (ref_hn, ref_cn) = _reference(enc, inputs, (h0, c0))
    np.testing.assert_allclose(np.asarray(output), np.asarray(ref_out), rtol=2e-5, atol=2e-5)
    np.testing.assert_allclose(np.asarray(hn), np.asarray(ref_hn), rtol=2e-5, atol=2e-5)
    np.testing.assert_allclose(np.asarray(cn), np.asarray(ref_cn), rtol=2e-5, atol=2e-5)

    print("KERNEL_OK")
</pallas_src>

<mosaic_0001>
module attributes {stable_mosaic.version = 11 : i64} {
  func.func @_proj_kernel(%arg0: i32, %arg1: memref<64x32xf32, #tpu.memory_space<vmem>>, %arg2: memref<32x512xf32, #tpu.memory_space<vmem>>, %arg3: memref<1x512xf32, #tpu.memory_space<vmem>>, %arg4: memref<64x512xf32, #tpu.memory_space<vmem>>) attributes {dimension_semantics = [#tpu.dimension_semantics<parallel>], iteration_bounds = array<i64: 1>, scalar_prefetch = 0 : i64, scratch_operands = 0 : i64, tpu.core_type = #tpu.core_type<tc>, window_params = [{transform_indices = @transform_0, window_bounds = array<i64: 64, 32>}, {pipeline_mode = #tpu.pipeline_mode<synchronous>, transform_indices = @transform_1, window_bounds = array<i64: 32, 512>}, {pipeline_mode = #tpu.pipeline_mode<synchronous>, transform_indices = @transform_2, window_bounds = array<i64: 1, 512>}, {transform_indices = @transform_3, window_bounds = array<i64: 64, 512>}]} {
    %c0 = arith.constant 0 : index
    %c0_0 = arith.constant 0 : index
    %0 = vector.load %arg1[%c0, %c0_0] : memref<64x32xf32, #tpu.memory_space<vmem>>, vector<64x32xf32>
    %c0_1 = arith.constant 0 : index
    %c0_2 = arith.constant 0 : index
    %1 = vector.load %arg2[%c0_1, %c0_2] : memref<32x512xf32, #tpu.memory_space<vmem>>, vector<32x512xf32>
    %cst = arith.constant dense<0.000000e+00> : vector<64x512xf32>
    %2 = tpu.matmul %0, %1, %cst {dimension_numbers = #tpu.dot_dimension_numbers<[1], [0], [0], [1], [0, 0, 1, 1], [], []>} : vector<64x32xf32>, vector<32x512xf32>, vector<64x512xf32> -> vector<64x512xf32>
    %c0_3 = arith.constant 0 : index
    %c0_4 = arith.constant 0 : index
    %3 = vector.load %arg3[%c0_3, %c0_4] : memref<1x512xf32, #tpu.memory_space<vmem>>, vector<1x512xf32>
    %4 = vector.broadcast %3 : vector<1x512xf32> to vector<64x512xf32>
    %5 = arith.addf %2, %4 : vector<64x512xf32>
    %c0_5 = arith.constant 0 : index
    %c0_6 = arith.constant 0 : index
    %6 = vector.load %arg4[%c0_5, %c0_6] : memref<64x512xf32, #tpu.memory_space<vmem>>, vector<64x512xf32>
    tpu.vector_store %arg4[%c0_5, %c0_6], %5 {strides = array<i32>} : memref<64x512xf32, #tpu.memory_space<vmem>>, vector<64x512xf32>,
    return
  }
  func.func @transform_0(%arg0: i32) -> (i32, i32) {
    %c0_i32 = arith.constant 0 : i32
    %c0_i32_0 = arith.constant 0 : i32
    return %arg0, %c0_i32 : i32, i32
  }
  func.func @transform_1(%arg0: i32) -> (i32, i32) {
    %c0_i32 = arith.constant 0 : i32
    %c0_i32_0 = arith.constant 0 : i32
    %c0_i32_1 = arith.constant 0 : i32
    return %c0_i32, %c0_i32_0 : i32, i32
  }
  func.func @transform_2(%arg0: i32) -> (i32, i32) {
    %c0_i32 = arith.constant 0 : i32
    %c0_i32_0 = arith.constant 0 : i32
    %c0_i32_1 = arith.constant 0 : i32
    return %c0_i32, %c0_i32_0 : i32, i32
  }
  func.func @transform_3(%arg0: i32) -> (i32, i32) {
    %c0_i32 = arith.constant 0 : i32
    %c0_i32_0 = arith.constant 0 : i32
    return %arg0, %c0_i32 : i32, i32
  }
}

</mosaic_0001>

<bundles_post_ra>
// kernel: tpu_custom_call.1
= control target key start
LH: loop header
LB: loop body
LE: loop exit
PB: predicated region body
PF: predicated region fallthrough
CT: control target
= control target key end

     0   :  { %8 = vsyncpa [#allocation3], 0  ;;  %s528_s0 = inlined_call_operand.vmem [shape: f32[64,32], index: 0, kind: input, shape index: {}]   ;;  %s529_s1 = inlined_call_operand.hbm [shape: f32[32,512], index: 1, kind: input, shape index: {}]   ;;  %s530_s2 = inlined_call_operand.vmem [shape: f32[1,512], index: 2, kind: input, shape index: {}]   ;;  %s531_s3 = inlined_call_operand.hbm [shape: f32[64,512], index: 3, kind: output, shape index: {}]  }
   0x1   :  { %9 = vsyncpa [#allocation4], 0  ;;  %s16_s14 = sshll.u32 %s529_s1, 4  ;;  %s393_s15 = smov [#allocation2]   ;;  %s17_s14 = int_to_ptr.hbm [resolvable:$true] %s16_s14 }
   0x2   :  { %s18_s16 = sshll.u32 %s393_s15, 4  ;;  %s394_s17 = smov 512   ;;  %s19_s16 = int_to_ptr.vmem [resolvable:$true] %s18_s16 }
   0x3   :  { %s395_s18 = smov 32  }
   0x4   :  { %24 = dma.hbm_to_vmem [thread:$0]  %s17_s14, 2048, %s19_s16, [#allocation3], %s394_s17, %s394_s17, %s395_s18  }
   0x5   :  { %389 = dma.done.wait [#allocation3], 2048  }
   0x6   :  { %390 = vsyncadd [#allocation3], 4294965248  ;;  %v53_v0 = vld [vmem:[#allocation2 + $0x70] sm:$0xff]  ;;  %v54_v1 = vld [vmem:[#allocation2 + $0x78] sm:$0xff]  ;;  %vm65_vm0 = vcmask 261120   ;;  %s292_s11 = sshll.u32 %s531_s3, 4  ;;  %s293_s11 = int_to_ptr.hbm [resolvable:$true] %s292_s11 }
   0x7   :  { %v49_v2 = vld [vmem:[#allocation2 + $0x50] sm:$0xff]  ;;  %184 = vmatpush.msra.mxu2 %v53_v0  ;;  %225 = vmatpush.msra.mxu3 %v54_v1  ;;  %v50_v3 = vld [vmem:[#allocation2 + $0x58] sm:$0xff]  ;;  %v51_v6 = vld [vmem:[#allocation2 + $0x60] sm:$0xff] }
   0x8   :  { %v45_v4 = vld [vmem:[#allocation2 + $0x30] sm:$0xff]  ;;  %v46_v5 = vld [vmem:[#allocation2 + $0x38] sm:$0xff]  ;;  %v52_v7 = vld [vmem:[#allocation2 + $0x68] sm:$0xff]  ;;  %102 = vmatpush.msra.mxu0 %v51_v6 }
   0x9   :  { %185 = vmatpush.msra.mxu2 %v49_v2  ;;  %226 = vmatpush.msra.mxu3 %v50_v3  ;;  %v47_v8 = vld [vmem:[#allocation2 + $0x40] sm:$0xff]  ;;  %v41_v9 = vld [vmem:[#allocation2 + $0x10] sm:$0xff]  ;;  %v42_v10 = vld [vmem:[#allocation2 + $0x18] sm:$0xff] }
   0xa   :  { %143 = vmatpush.msra.mxu1 %v52_v7  ;;  %v48_v11 = vld [vmem:[#allocation2 + $0x48] sm:$0xff]  ;;  %v31_v12 = vld [vmem:[%s528_s0] sm:$0xff]  ;;  %103 = vmatpush.msra.mxu0 %v47_v8  ;;  %v33_v18 = vld [vmem:[%s528_s0 + $0x10] sm:$0xff] }
   0xb   :  { %186 = vmatpush.msra.mxu2 %v45_v4  ;;  %227 = vmatpush.msra.mxu3 %v46_v5  ;;  %v43_v13 = vld [vmem:[#allocation2 + $0x20] sm:$0xff]  ;;  %v44_v14 = vld [vmem:[#allocation2 + $0x28] sm:$0xff]  ;;  %v34_v19 = vld [vmem:[%s528_s0 + $0x18] sm:$0xff] }
   0xc   :  { %144 = vmatpush.msra.mxu1 %v48_v11  ;;  %v39_v15 = vld [vmem:[#allocation2] sm:$0xff]  ;;  %v40_v16 = vld [vmem:[#allocation2 + $0x8] sm:$0xff]  ;;  %104 = vmatpush.msra.mxu0 %v43_v13  ;;  %v37_v22 = vld [vmem:[%s528_s0 + $0x30] sm:$0xff] }
   0xd   :  { %187 = vmatpush.msra.mxu2 %v41_v9  ;;  %228 = vmatpush.msra.mxu3 %v42_v10  ;;  %v32_v17 = vld [vmem:[%s528_s0 + $0x8] sm:$0xff]  ;;  %v35_v20 = vld [vmem:[%s528_s0 + $0x20] sm:$0xff]  ;;  %v38_v23 = vld [vmem:[%s528_s0 + $0x38] sm:$0xff] }
   0xe   :  { %321 = vmatmul.msk.f32.vlgmr.msra.gmra.mxu2 %vm65_vm0, %v31_v12  ;;  %329 = vmatmul.msk.f32.vlgmr.msra.gmra.mxu3 %vm65_vm0, %v31_v12  ;;  %v36_v21 = vld [vmem:[%s528_s0 + $0x28] sm:$0xff]  ;;  %v55_v24 = vld [vmem:[%s530_s2] sm:$0xf]  ;;  %s396_s0 = smov [#allocation5]  }
   0xf   :  { %145 = vmatpush.msra.mxu1 %v44_v14  ;;  %105 = vmatpush.msra.mxu0 %v39_v15  ;;  %v482_v25 = vperm.slane %v55_v24, 0  ;;  %v484_v26 = vperm.slane %v55_v24, 1  ;;  %v486_v27 = vperm.slane %v55_v24, 2  ;;  %v488_v28 = vperm.slane %v55_v24, 3  ;;  %s290_s2 = sshll.u32 %s396_s0, 4  ;;  %s291_s2 = int_to_ptr.vmem [resolvable:$true] %s290_s2 }
  0x10   :  { %305 = vmatmul.msk.f32.vlgmr.msra.gmra.mxu0 %vm65_vm0, %v31_v12 }
  0x11   :  { %146 = vmatpush.msra.mxu1 %v40_v16 }
  0x12   :  { %313 = vmatmul.msk.f32.vlgmr.msra.gmra.mxu1 %vm65_vm0, %v31_v12 }
  0x16   :  { %322 = vmatmul.msk.f32.gmra.mxu2 %vm65_vm0, %v32_v17  ;;  %330 = vmatmul.msk.f32.gmra.mxu3 %vm65_vm0, %v32_v17 }
  0x18   :  { %306 = vmatmul.msk.f32.gmra.mxu0 %vm65_vm0, %v32_v17 }
  0x1a   :  { %314 = vmatmul.msk.f32.gmra.mxu1 %vm65_vm0, %v32_v17 }
  0x1e   :  { %323 = vmatmul.msk.f32.gmra.mxu2 %vm65_vm0, %v33_v18  ;;  %331 = vmatmul.msk.f32.gmra.mxu3 %vm65_vm0, %v33_v18 }
  0x20   :  { %307 = vmatmul.msk.f32.gmra.mxu0 %vm65_vm0, %v33_v18 }
  0x22   :  { %315 = vmatmul.msk.f32.gmra.mxu1 %vm65_vm0, %v33_v18 }
  0x26   :  { %324 = vmatmul.msk.f32.gmra.mxu2 %vm65_vm0, %v34_v19  ;;  %332 = vmatmul.msk.f32.gmra.mxu3 %vm65_vm0, %v34_v19 }
  0x28   :  { %308 = vmatmul.msk.f32.gmra.mxu0 %vm65_vm0, %v34_v19 }
  0x2a   :  { %316 = vmatmul.msk.f32.gmra.mxu1 %vm65_vm0, %v34_v19 }
  0x2e   :  { %325 = vmatmul.msk.f32.gmra.mxu2 %vm65_vm0, %v35_v20  ;;  %333 = vmatmul.msk.f32.gmra.mxu3 %vm65_vm0, %v35_v20 }
  0x30   :  { %309 = vmatmul.msk.f32.gmra.mxu0 %vm65_vm0, %v35_v20 }
  0x32   :  { %317 = vmatmul.msk.f32.gmra.mxu1 %vm65_vm0, %v35_v20 }
  0x36   :  { %326 = vmatmul.msk.f32.gmra.mxu2 %vm65_vm0, %v36_v21  ;;  %334 = vmatmul.msk.f32.gmra.mxu3 %vm65_vm0, %v36_v21 }
  0x38   :  { %310 = vmatmul.msk.f32.gmra.mxu0 %vm65_vm0, %v36_v21 }
  0x3a   :  { %318 = vmatmul.msk.f32.gmra.mxu1 %vm65_vm0, %v36_v21 }
  0x3e   :  { %327 = vmatmul.msk.f32.gmra.mxu2 %vm65_vm0, %v37_v22  ;;  %335 = vmatmul.msk.f32.gmra.mxu3 %vm65_vm0, %v37_v22 }
  0x40   :  { %311 = vmatmul.msk.f32.gmra.mxu0 %vm65_vm0, %v37_v22 }
  0x42   :  { %319 = vmatmul.msk.f32.gmra.mxu1 %vm65_vm0, %v37_v22 }
  0x46   :  { %328 = vmatmul.msk.f32.gmra.mxu2 %vm65_vm0, %v38_v23  ;;  %336 = vmatmul.msk.f32.gmra.mxu3 %vm65_vm0, %v38_v23 }
  0x48   :  { %312 = vmatmul.msk.f32.gmra.mxu0 %vm65_vm0, %v38_v23 }
  0x4a   :  { %320 = vmatmul.msk.f32.gmra.mxu1 %vm65_vm0, %v38_v23 }
  0x8d   :  { %v107_v29 = vpop.f32.mrf.mxu0 }
  0x8e   :  { %v108_v31 = vadd.f32 %v107_v29, %v482_v25 }
  0x8f   :  { %v148_v30 = vpop.f32.mrf.mxu1 }
  0x90   :  { %v149_v32 = vadd.f32 %v148_v30, %v484_v26  ;;  %254 = vst [vmem:[#allocation5] sm:$0xff] %v108_v31 }
  0x91   :  { %v189_v33 = vpop.f32.mrf.mxu2  ;;  %v230_v34 = vpop.f32.mrf.mxu3 }
  0x92   :  { %v190_v35 = vadd.f32 %v189_v33, %v486_v27  ;;  %v231_v36 = vadd.f32 %v230_v34, %v488_v28  ;;  %255 = vst [vmem:[#allocation5 + $0x8] sm:$0xff] %v149_v32 }
  0x94   :  { %256 = vst [vmem:[#allocation5 + $0x10] sm:$0xff] %v190_v35 }
  0x95   :  { %257 = vst [vmem:[#allocation5 + $0x18] sm:$0xff] %v231_v36  ;;  %v110_v37 = vpop.f32.mrf.mxu0 }
  0x96   :  { %v111_v39 = vadd.f32 %v110_v37, %v482_v25 }
  0x97   :  { %v151_v38 = vpop.f32.mrf.mxu1 }
  0x98   :  { %v152_v40 = vadd.f32 %v151_v38, %v484_v26  ;;  %258 = vst [vmem:[#allocation5 + $0x20] sm:$0xff] %v111_v39 }
  0x99   :  { %v192_v41 = vpop.f32.mrf.mxu2  ;;  %v233_v42 = vpop.f32.mrf.mxu3 }
  0x9a   :  { %v193_v43 = vadd.f32 %v192_v41, %v486_v27  ;;  %v234_v44 = vadd.f32 %v233_v42, %v488_v28  ;;  %259 = vst [vmem:[#allocation5 + $0x28] sm:$0xff] %v152_v40 }
  0x9c   :  { %260 = vst [vmem:[#allocation5 + $0x30] sm:$0xff] %v193_v43 }
  0x9d   :  { %261 = vst [vmem:[#allocation5 + $0x38] sm:$0xff] %v234_v44  ;;  %v113_v45 = vpop.f32.mrf.mxu0 }
  0x9e   :  { %v114_v47 = vadd.f32 %v113_v45, %v482_v25 }
  0x9f   :  { %v154_v46 = vpop.f32.mrf.mxu1 }
  0xa0   :  { %v155_v48 = vadd.f32 %v154_v46, %v484_v26  ;;  %262 = vst [vmem:[#allocation5 + $0x40] sm:$0xff] %v114_v47 }
  0xa1   :  { %v195_v49 = vpop.f32.mrf.mxu2  ;;  %v236_v50 = vpop.f32.mrf.mxu3 }
  0xa2   :  { %v196_v51 = vadd.f32 %v195_v49, %v486_v27  ;;  %v237_v52 = vadd.f32 %v236_v50, %v488_v28  ;;  %263 = vst [vmem:[#allocation5 + $0x48] sm:$0xff] %v155_v48 }
  0xa4   :  { %264 = vst [vmem:[#allocation5 + $0x50] sm:$0xff] %v196_v51 }
  0xa5   :  { %265 = vst [vmem:[#allocation5 + $0x58] sm:$0xff] %v237_v52  ;;  %v116_v53 = vpop.f32.mrf.mxu0 }
  0xa6   :  { %v117_v55 = vadd.f32 %v116_v53, %v482_v25 }
  0xa7   :  { %v157_v54 = vpop.f32.mrf.mxu1 }
  0xa8   :  { %v158_v56 = vadd.f32 %v157_v54, %v484_v26  ;;  %266 = vst [vmem:[#allocation5 + $0x60] sm:$0xff] %v117_v55 }
  0xa9   :  { %v198_v57 = vpop.f32.mrf.mxu2  ;;  %v239_v58 = vpop.f32.mrf.mxu3 }
  0xaa   :  { %v199_v59 = vadd.f32 %v198_v57, %v486_v27  ;;  %v240_v60 = vadd.f32 %v239_v58, %v488_v28  ;;  %267 = vst [vmem:[#allocation5 + $0x68] sm:$0xff] %v158_v56 }
  0xac   :  { %268 = vst [vmem:[#allocation5 + $0x70] sm:$0xff] %v199_v59 }
  0xad   :  { %269 = vst [vmem:[#allocation5 + $0x78] sm:$0xff] %v240_v60  ;;  %v119_v61 = vpop.f32.mrf.mxu0 }
  0xae   :  { %v120_v63 = vadd.f32 %v119_v61, %v482_v25 }
  0xaf   :  { %v160_v62 = vpop.f32.mrf.mxu1 }
  0xb0   :  { %v161_v0 = vadd.f32 %v160_v62, %v484_v26  ;;  %270 = vst [vmem:[#allocation5 + $0x80] sm:$0xff] %v120_v63 }
  0xb1   :  { %v201_v1 = vpop.f32.mrf.mxu2  ;;  %v242_v2 = vpop.f32.mrf.mxu3 }
  0xb2   :  { %v202_v3 = vadd.f32 %v201_v1, %v486_v27  ;;  %v243_v4 = vadd.f32 %v242_v2, %v488_v28  ;;  %271 = vst [vmem:[#allocation5 + $0x88] sm:$0xff] %v161_v0 }
  0xb4   :  { %272 = vst [vmem:[#allocation5 + $0x90] sm:$0xff] %v202_v3 }
  0xb5   :  { %273 = vst [vmem:[#allocation5 + $0x98] sm:$0xff] %v243_v4  ;;  %v122_v5 = vpop.f32.mrf.mxu0 }
  0xb6   :  { %v123_v7 = vadd.f32 %v122_v5, %v482_v25 }
  0xb7   :  { %v163_v6 = vpop.f32.mrf.mxu1 }
  0xb8   :  { %v164_v8 = vadd.f32 %v163_v6, %v484_v26  ;;  %274 = vst [vmem:[#allocation5 + $0xa0] sm:$0xff] %v123_v7 }
  0xb9   :  { %v204_v9 = vpop.f32.mrf.mxu2  ;;  %v245_v10 = vpop.f32.mrf.mxu3 }
  0xba   :  { %v205_v11 = vadd.f32 %v204_v9, %v486_v27  ;;  %v246_v12 = vadd.f32 %v245_v10, %v488_v28  ;;  %275 = vst [vmem:[#allocation5 + $0xa8] sm:$0xff] %v164_v8 }
  0xbc   :  { %276 = vst [vmem:[#allocation5 + $0xb0] sm:$0xff] %v205_v11 }
  0xbd   :  { %277 = vst [vmem:[#allocation5 + $0xb8] sm:$0xff] %v246_v12  ;;  %v125_v13 = vpop.f32.mrf.mxu0 }
  0xbe   :  { %v126_v15 = vadd.f32 %v125_v13, %v482_v25 }
  0xbf   :  { %v166_v14 = vpop.f32.mrf.mxu1 }
  0xc0   :  { %v167_v16 = vadd.f32 %v166_v14, %v484_v26  ;;  %278 = vst [vmem:[#allocation5 + $0xc0] sm:$0xff] %v126_v15 }
  0xc1   :  { %v207_v17 = vpop.f32.mrf.mxu2  ;;  %v248_v18 = vpop.f32.mrf.mxu3 }
  0xc2   :  { %v208_v19 = vadd.f32 %v207_v17, %v486_v27  ;;  %v249_v20 = vadd.f32 %v248_v18, %v488_v28  ;;  %279 = vst [vmem:[#allocation5 + $0xc8] sm:$0xff] %v167_v16 }
  0xc4   :  { %280 = vst [vmem:[#allocation5 + $0xd0] sm:$0xff] %v208_v19 }
  0xc5   :  { %281 = vst [vmem:[#allocation5 + $0xd8] sm:$0xff] %v249_v20  ;;  %v128_v21 = vpop.f32.mrf.mxu0 }
  0xc6   :  { %v129_v23 = vadd.f32 %v128_v21, %v482_v25 }
  0xc7   :  { %v169_v22 = vpop.f32.mrf.mxu1 }
  0xc8   :  { %v170_v24 = vadd.f32 %v169_v22, %v484_v26  ;;  %282 = vst [vmem:[#allocation5 + $0xe0] sm:$0xff] %v129_v23 }
  0xc9   :  { %v210_v29 = vpop.f32.mrf.mxu2  ;;  %v251_v30 = vpop.f32.mrf.mxu3 }
  0xca   :  { %v211_v31 = vadd.f32 %v210_v29, %v486_v27  ;;  %v252_v32 = vadd.f32 %v251_v30, %v488_v28  ;;  %283 = vst [vmem:[#allocation5 + $0xe8] sm:$0xff] %v170_v24 }
  0xcc   :  { %284 = vst [vmem:[#allocation5 + $0xf0] sm:$0xff] %v211_v31 }
  0xcd   :  { %285 = vst [vmem:[#allocation5 + $0xf8] sm:$0xff] %v252_v32 }
  0xce   :  { %298 = dma.vmem_to_hbm [thread:$0]  %s291_s2, 4096, %s293_s11, [#allocation4], %s394_s17, %s394_s17, %s395_s18  }
  0xcf   :  { %391 = dma.done.wait [#allocation4], 4096  }
  0xd0   :  { %392 = vsyncadd [#allocation4], 4294963200 }
  0xd1   :  { %303 = vsyncpa [#allocation3], 1 }
  0xd2   :  { %304 = vsyncpa [#allocation4], 1 }

</bundles_post_ra>
